<compile_context>
chip_gen: v7x
topology: tpu7x:2x2x1
jax: 0.10.0
libtpu: 0.0.40
codegen_flags: <defaults>
</compile_context>

<pallas_src>
import jax
import jax.numpy as jnp
from jax.experimental import pallas as pl
from jax.experimental.pallas import tpu as pltpu


# --------------------------------------------------------------------------- #
# Kernel body
# --------------------------------------------------------------------------- #
def _minlstm_kernel(h_ref, x_ref, w_ref, b_ref, out_ref):
    tn = out_ref.shape[-1]

    h = h_ref[...].astype(jnp.float32)

    # One fused matmul: (bm, Hp) @ (Hp, 3*tn) -> (bm, 3*tn), f32 accumulation,
    # single fused bias add.  x / w are already in param_dtype (cast in the
    # wrapper, not here).
    gates = jnp.dot(x_ref[...], w_ref[...],
                    preferred_element_type=jnp.float32) + b_ref[...]

    f_lin = gates[:, 0 * tn:1 * tn]
    i_lin = gates[:, 1 * tn:2 * tn]
    htilde = gates[:, 2 * tn:3 * tn]

    # f' = sigmoid(f)/(sigmoid(f)+sigmoid(i))
    #    = (1 + exp(-i_lin)) / (2 + exp(-f_lin) + exp(-i_lin))   (exact algebra)
    # Clamp the linears so exp stays finite; sigmoid saturates there anyway.
    ea = jnp.exp(-jnp.clip(f_lin, -30.0, 30.0))
    eb = jnp.exp(-jnp.clip(i_lin, -30.0, 30.0))
    f_prime = (1.0 + eb) / (2.0 + ea + eb)

    # f'*h + (1-f')*htilde  ==  htilde + f'*(h - htilde)
    new_h = htilde + f_prime * (h - htilde)
    out_ref[...] = new_h.astype(out_ref.dtype)


# --------------------------------------------------------------------------- #
# Tiling / budgets
# --------------------------------------------------------------------------- #
def _round_up(x, m):
    return ((x + m - 1) // m) * m


def _vmem_budgets():
    """(tile-picker budget, vmem_limit_bytes), generation-aware."""
    cap = 64 << 20                       # conservative default: v7x per-TC VMEM
    try:
        cap = int(pltpu.get_tpu_info().vmem_capacity_bytes)
    except Exception:                    # interpret mode / older jax: keep default
        pass
    if cap >= (100 << 20):               # v5e / v6e: 128 MiB physical VMEM
        return 80 << 20, 100 << 20
    return 24 << 20, 48 << 20            # v7x: 64 MiB physical VMEM


def _pick_tn(Hp, param_bytes, budget):
    """Hidden (lane) tile: multiple of 128 dividing Hp, 3*tn MXU-friendly."""
    divs = [c for c in (512, 256, 128) if Hp % c == 0]
    for c in divs:                       # largest tn whose weight block fits easily
        if 2 * Hp * 3 * c * param_bytes <= budget // 2:
            return c
    return divs[-1] if divs else Hp      # defensive; Hp is padded to %128 == 0


def _pick_bm(Bp, Hp, tn, param_bytes, budget):
    """Batch (sublane) tile: largest MXU-friendly multiple of 8 within budget."""
    def cost(bm):
        stream = (bm * Hp * param_bytes          # x block
                  + bm * tn * 4                  # h block (f32)
                  + bm * tn * 4                  # out block
                  + Hp * 3 * tn * param_bytes    # fused weight block
                  + 3 * tn * 4)                  # fused bias
        interm = bm * 3 * tn * 4 * 4             # f32 gates + elementwise temps
        return 2 * stream + interm               # double-buffered streams

    cands = [c for c in range(8, min(Bp, 1024) + 1, 8)
             if Bp % c == 0 and cost(c) <= budget]
    if not cands:
        return 8                                  # smallest legal tile, never Bp
    for mult in (256, 128):                       # MXU-friendly preference
        pref = [c for c in cands if c % mult == 0]
        if pref:
            return max(pref)
    return max(cands)


# --------------------------------------------------------------------------- #
# Parameter fusion
# --------------------------------------------------------------------------- #
def _fuse_gate_params(wf, bf, wi, bi, wh, bh, tn, param_dtype):
    """Fuse the three nn.Linear params into one (Hp, 3*Hp) weight / (1, 3*Hp) bias.

    Columns are interleaved per hidden tile of width `tn`: the (Hp, 3*tn) block
    for hidden tile n holds [Wf | Wi | Wh] columns of that tile, so an N-tiled
    grid step still sees all three gates for its output columns.
    Weights arrive in PyTorch nn.Linear (out, in) layout; transposed here.
    """
    Hp = wf.shape[0]
    n_tiles = Hp // tn
    w_stack = jnp.stack(
        [w.T.reshape(Hp, n_tiles, tn) for w in (wf, wi, wh)], axis=2)
    w_fused = w_stack.reshape(Hp, 3 * Hp).astype(param_dtype)
    b_stack = jnp.stack(
        [b.reshape(n_tiles, tn) for b in (bf, bi, bh)], axis=1)
    b_fused = b_stack.reshape(1, 3 * Hp).astype(jnp.float32)
    return w_fused, b_fused


# --------------------------------------------------------------------------- #
# Wrapper
# --------------------------------------------------------------------------- #
def min_lstm_forward(h, inputs, wf, bf, wi, bi, wh, bh, *,
                     param_dtype=jnp.bfloat16):
    """minLSTM cell.  h, inputs: (B, H).  wX: (H, H) PyTorch (out,in).  bX: (H,)."""
    B, H = inputs.shape
    out_dtype = inputs.dtype
    param_bytes = jnp.dtype(param_dtype).itemsize

    # Lane-dense padding (wrapper-side layout plumbing): H -> multiple of 128,
    # B -> multiple of 8.  Avoids masked partial stores and relayout copies.
    Hp = _round_up(H, 128)
    Bp = _round_up(B, 8)

    def pad2(a, rows, cols):
        return jnp.pad(a, ((0, rows - a.shape[0]), (0, cols - a.shape[1])))

    x = pad2(inputs, Bp, Hp).astype(param_dtype)       # cast once, in the wrapper
    h_f32 = pad2(h, Bp, Hp).astype(jnp.float32)
    wf_p, wi_p, wh_p = (pad2(w, Hp, Hp) for w in (wf, wi, wh))
    bf_p, bi_p, bh_p = (jnp.pad(b, (0, Hp - H)) for b in (bf, bi, bh))

    budget, vmem_limit = _vmem_budgets()
    tn = _pick_tn(Hp, param_bytes, budget)
    bm = _pick_bm(Bp, Hp, tn, param_bytes, budget)
    assert Bp % bm == 0 and Hp % tn == 0

    w_fused, b_fused = _fuse_gate_params(
        wf_p, bf_p, wi_p, bi_p, wh_p, bh_p, tn, param_dtype)

    # Hidden axis OUTER (weight-resident across the inner batch loop; the axis
    # megacore shards on v7x -> disjoint weight columns per core), batch INNER.
    grid = (Hp // tn, Bp // bm)

    h_spec = pl.BlockSpec((bm, tn), lambda n, i: (i, n))
    x_spec = pl.BlockSpec((bm, Hp), lambda n, i: (i, 0))      # full-K row block
    w_spec = pl.BlockSpec((Hp, 3 * tn), lambda n, i: (0, n))  # depends only on n
    b_spec = pl.BlockSpec((1, 3 * tn), lambda n, i: (0, n))
    out_spec = pl.BlockSpec((bm, tn), lambda n, i: (i, n))

    out_padded = pl.pallas_call(
        _minlstm_kernel,
        out_shape=jax.ShapeDtypeStruct((Bp, Hp), out_dtype),
        grid_spec=pltpu.PrefetchScalarGridSpec(
            num_scalar_prefetch=0,
            grid=grid,
            in_specs=[h_spec, x_spec, w_spec, b_spec],
            out_specs=out_spec,
        ),
        compiler_params=pltpu.CompilerParams(
            # Both axes are independent (no reduction); leading (hidden) axis
            # is the preferred megacore-sharded one.
            dimension_semantics=("parallel", "parallel"),
            vmem_limit_bytes=vmem_limit,
        ),
    )(h_f32, x, w_fused, b_fused)

    return out_padded[:B, :H]


# --------------------------------------------------------------------------- #
# Pure-JAX reference matching the PyTorch forward
# --------------------------------------------------------------------------- #
def _ref_forward(h, inputs, wf, bf, wi, bi, wh, bh):
    htilde = inputs @ wh.T + bh
    f_t = jax.nn.sigmoid(inputs @ wf.T + bf)
    i_t = jax.nn.sigmoid(inputs @ wi.T + bi)
    denom = f_t + i_t
    return (f_t / denom) * h + (i_t / denom) * htilde


if __name__ == "__main__":
    B, H = 16, 32
    key = jax.random.PRNGKey(0)
    keys = jax.random.split(key, 8)

    # Deterministic parameter init mimicking nn.Linear (uniform +-1/sqrt(in)).
    bound = 1.0 / (H ** 0.5)

    def uni(k, shape):
        return jax.random.uniform(k, shape, jnp.float32, -bound, bound)

    wf = uni(keys[0], (H, H))   # PyTorch nn.Linear layout: (out, in)
    bf = uni(keys[1], (H,))
    wi = uni(keys[2], (H, H))
    bi = uni(keys[3], (H,))
    wh = uni(keys[4], (H, H))
    bh = uni(keys[5], (H,))

    h = jax.random.normal(keys[6], (B, H), jnp.float32)
    inputs = jax.random.normal(keys[7], (B, H), jnp.float32)

    ref = _ref_forward(h, inputs, wf, bf, wi, bi, wh, bh)

    # Strict check with f32 params: exact math path, tight tolerance.
    out_f32 = jax.block_until_ready(
        min_lstm_forward(h, inputs, wf, bf, wi, bi, wh, bh,
                         param_dtype=jnp.float32))
    assert out_f32.shape == (B, H)
    assert jnp.allclose(out_f32, ref, atol=5e-4, rtol=5e-4), \
        "f32 mismatch vs reference"

    # Default path (bf16 params / x, f32 accumulation): loose tolerance.
    out_bf16 = jax.block_until_ready(
        min_lstm_forward(h, inputs, wf, bf, wi, bi, wh, bh))
    assert out_bf16.shape == (B, H)
    assert jnp.allclose(out_bf16, ref, atol=1e-1, rtol=1e-1), \
        "bf16 mismatch vs reference"

    print("KERNEL_OK")
</pallas_src>

<mosaic_0001>
module attributes {stable_mosaic.version = 11 : i64} {
  func.func @_minlstm_kernel(%arg0: i32, %arg1: i32, %arg2: memref<16x128xf32, #tpu.memory_space<vmem>>, %arg3: memref<16x128xf32, #tpu.memory_space<vmem>>, %arg4: memref<128x384xf32, #tpu.memory_space<vmem>>, %arg5: memref<1x384xf32, #tpu.memory_space<vmem>>, %arg6: memref<16x128xf32, #tpu.memory_space<vmem>>) attributes {dimension_semantics = [#tpu.dimension_semantics<parallel>, #tpu.dimension_semantics<parallel>], iteration_bounds = array<i64: 1, 1>, scalar_prefetch = 0 : i64, scratch_operands = 0 : i64, tpu.core_type = #tpu.core_type<tc>, window_params = [{transform_indices = @transform_0, window_bounds = array<i64: 16, 128>}, {transform_indices = @transform_1, window_bounds = array<i64: 16, 128>}, {transform_indices = @transform_2, window_bounds = array<i64: 128, 384>}, {transform_indices = @transform_3, window_bounds = array<i64: 1, 384>}, {transform_indices = @transform_4, window_bounds = array<i64: 16, 128>}]} {
    %c0 = arith.constant 0 : index
    %c0_0 = arith.constant 0 : index
    %0 = vector.load %arg2[%c0, %c0_0] : memref<16x128xf32, #tpu.memory_space<vmem>>, vector<16x128xf32>
    %c0_1 = arith.constant 0 : index
    %c0_2 = arith.constant 0 : index
    %1 = vector.load %arg3[%c0_1, %c0_2] : memref<16x128xf32, #tpu.memory_space<vmem>>, vector<16x128xf32>
    %c0_3 = arith.constant 0 : index
    %c0_4 = arith.constant 0 : index
    %2 = vector.load %arg4[%c0_3, %c0_4] : memref<128x384xf32, #tpu.memory_space<vmem>>, vector<128x384xf32>
    %cst = arith.constant dense<0.000000e+00> : vector<16x384xf32>
    %3 = tpu.matmul %1, %2, %cst {dimension_numbers = #tpu.dot_dimension_numbers<[1], [0], [0], [1], [0, 0, 1, 1], [], []>} : vector<16x128xf32>, vector<128x384xf32>, vector<16x384xf32> -> vector<16x384xf32>
    %c0_5 = arith.constant 0 : index
    %c0_6 = arith.constant 0 : index
    %4 = vector.load %arg5[%c0_5, %c0_6] : memref<1x384xf32, #tpu.memory_space<vmem>>, vector<1x384xf32>
    %5 = vector.broadcast %4 : vector<1x384xf32> to vector<16x384xf32>
    %6 = arith.addf %3, %5 : vector<16x384xf32>
    %7 = vector.extract_strided_slice %6 {offsets = [0, 0], sizes = [16, 128], strides = [1, 1]} : vector<16x384xf32> to vector<16x128xf32>
    %8 = vector.extract_strided_slice %6 {offsets = [0, 128], sizes = [16, 128], strides = [1, 1]} : vector<16x384xf32> to vector<16x128xf32>
    %9 = vector.extract_strided_slice %6 {offsets = [0, 256], sizes = [16, 128], strides = [1, 1]} : vector<16x384xf32> to vector<16x128xf32>
    %cst_7 = arith.constant -3.000000e+01 : f32
    %cst_8 = arith.constant 3.000000e+01 : f32
    %10 = vector.broadcast %cst_7 : f32 to vector<16x128xf32>
    %11 = arith.maximumf %10, %7 : vector<16x128xf32>
    %12 = vector.broadcast %cst_8 : f32 to vector<16x128xf32>
    %13 = arith.minimumf %12, %11 : vector<16x128xf32>
    %cst_9 = arith.constant 0.000000e+00 : f32
    %14 = vector.broadcast %cst_9 : f32 to vector<16x128xf32>
    %15 = arith.subf %14, %13 : vector<16x128xf32>
    %16 = math.exp %15 : vector<16x128xf32>
    %cst_10 = arith.constant -3.000000e+01 : f32
    %cst_11 = arith.constant 3.000000e+01 : f32
    %17 = vector.broadcast %cst_10 : f32 to vector<16x128xf32>
    %18 = arith.maximumf %17, %8 : vector<16x128xf32>
    %19 = vector.broadcast %cst_11 : f32 to vector<16x128xf32>
    %20 = arith.minimumf %19, %18 : vector<16x128xf32>
    %cst_12 = arith.constant 0.000000e+00 : f32
    %21 = vector.broadcast %cst_12 : f32 to vector<16x128xf32>
    %22 = arith.subf %21, %20 : vector<16x128xf32>
    %23 = math.exp %22 : vector<16x128xf32>
    %cst_13 = arith.constant 1.000000e+00 : f32
    %24 = vector.broadcast %cst_13 : f32 to vector<16x128xf32>
    %25 = arith.addf %24, %23 : vector<16x128xf32>
    %cst_14 = arith.constant 2.000000e+00 : f32
    %26 = vector.broadcast %cst_14 : f32 to vector<16x128xf32>
    %27 = arith.addf %26, %16 : vector<16x128xf32>
    %28 = arith.addf %27, %23 : vector<16x128xf32>
    %29 = arith.divf %25, %28 : vector<16x128xf32>
    %30 = arith.subf %0, %9 : vector<16x128xf32>
    %31 = arith.mulf %29, %30 : vector<16x128xf32>
    %32 = arith.addf %9, %31 : vector<16x128xf32>
    %c0_15 = arith.constant 0 : index
    %c0_16 = arith.constant 0 : index
    %33 = vector.load %arg6[%c0_15, %c0_16] : memref<16x128xf32, #tpu.memory_space<vmem>>, vector<16x128xf32>
    tpu.vector_store %arg6[%c0_15, %c0_16], %32 {strides = array<i32>} : memref<16x128xf32, #tpu.memory_space<vmem>>, vector<16x128xf32>,
    return
  }
  func.func @transform_0(%arg0: i32, %arg1: i32) -> (i32, i32) {
    %c0_i32 = arith.constant 0 : i32
    return %arg1, %arg0 : i32, i32
  }
  func.func @transform_1(%arg0: i32, %arg1: i32) -> (i32, i32) {
    %c0_i32 = arith.constant 0 : i32
    %c0_i32_0 = arith.constant 0 : i32
    return %arg1, %c0_i32 : i32, i32
  }
  func.func @transform_2(%arg0: i32, %arg1: i32) -> (i32, i32) {
    %c0_i32 = arith.constant 0 : i32
    %c0_i32_0 = arith.constant 0 : i32
    return %c0_i32, %arg0 : i32, i32
  }
  func.func @transform_3(%arg0: i32, %arg1: i32) -> (i32, i32) {
    %c0_i32 = arith.constant 0 : i32
    %c0_i32_0 = arith.constant 0 : i32
    return %c0_i32, %arg0 : i32, i32
  }
  func.func @transform_4(%arg0: i32, %arg1: i32) -> (i32, i32) {
    %c0_i32 = arith.constant 0 : i32
    return %arg1, %arg0 : i32, i32
  }
}

</mosaic_0001>

<bundles_post_ra>
// kernel: tpu_custom_call.1
= control target key start
LH: loop header
LB: loop body
LE: loop exit
PB: predicated region body
PF: predicated region fallthrough
CT: control target
= control target key end

     0   :  { %9 = vsyncpa [#allocation3], 0  ;;  %s679_s0 = inlined_call_operand.hbm [shape: f32[16,128], index: 0, kind: input, shape index: {}]   ;;  %s680_s1 = inlined_call_operand.hbm [shape: f32[16,128], index: 1, kind: input, shape index: {}]   ;;  %s681_s2 = inlined_call_operand.hbm [shape: f32[128,384], index: 2, kind: input, shape index: {}]   ;;  %s682_s3 = inlined_call_operand.vmem [shape: f32[1,384], index: 3, kind: input, shape index: {}]   ;;  %s683_s4 = inlined_call_operand.hbm [shape: f32[16,128], index: 4, kind: output, shape index: {}]  }
   0x1   :  { %10 = vsyncpa [#allocation6], 0 }
   0x2   :  { %11 = vsyncpa [#allocation4], 0  ;;  %s572_s15 = smov [#allocation5]   ;;  %s573_s17 = smov [#allocation2]  }
   0x3   :  { %s29_s16 = sshll.u32 %s572_s15, 4  ;;  %s17_s18 = sshll.u32 %s573_s17, 4  ;;  %s30_s16 = int_to_ptr.vmem [resolvable:$true] %s29_s16  ;;  %s606_s18 = int_to_ptr.vmem [resolvable:$true] %s17_s18 }
   0x4   :  { %s478_s21 = scalar_lea.hbm %s680_s1, 256 }
   0x5   :  { %p479_p0 = scmp.ne.s32.totalorder %s680_s1, %s478_s21  ;;  %p482_p1 = scmp.lt.u32.totalorder %s478_s21, %s680_s1 }
   0x7   :  { %p484_p2 = pnand %p482_p1, %p479_p0 }
   0x9   :  { %487 = shalt.err (!%p484_p2)
}
   0xa   :  { %s488_s26 = scalar_lea.vmem %s30_s16, 256  ;;  %p493_p4 = scmp.lt.s32.totalorder %s30_s16, %s30_s16 }
   0xb   :  { %p489_p3 = scmp.ne.s32.totalorder %s30_s16, %s488_s26  ;;  %p494_p5 = scmp.lt.s32.totalorder %s488_s26, %s488_s26 }
   0xd   :  { %p495_p6 = por %p494_p5, %p493_p4 }
   0xf   :  { %p496_p7 = pnand %p495_p6, %p489_p3 }
  0x11   :  { %499 = shalt.err (!%p496_p7)
}
  0x12   :  { %s574_s27 = smov 128   ;;  %s575_s28 = smov 8  }
  0x13   :  { %35 = dma.hbm_to_vmem [thread:$0]  %s680_s1, 256, %s30_s16, [#allocation6], %s574_s27, %s574_s27, %s575_s28  }
  0x14   :  { %s500_s7 = scalar_lea.hbm %s679_s0, 256 }
  0x15   :  { %p501_p8 = scmp.ne.s32.totalorder %s679_s0, %s500_s7  ;;  %p504_p9 = scmp.lt.u32.totalorder %s500_s7, %s679_s0 }
  0x17   :  { %p506_p10 = pnand %p504_p9, %p501_p8 }
  0x19   :  { %509 = shalt.err (!%p506_p10)
}
  0x1a   :  { %s510_s12 = scalar_lea.vmem %s606_s18, 256  ;;  %p515_p12 = scmp.lt.s32.totalorder %s606_s18, %s606_s18 }
  0x1b   :  { %p511_p11 = scmp.ne.s32.totalorder %s606_s18, %s510_s12  ;;  %p516_p13 = scmp.lt.s32.totalorder %s510_s12, %s510_s12 }
  0x1d   :  { %p517_p0 = por %p516_p13, %p515_p12 }
  0x1f   :  { %p518_p1 = pnand %p517_p0, %p511_p11 }
  0x21   :  { %521 = shalt.err (!%p518_p1)
}
  0x22   :  { %23 = dma.hbm_to_vmem [thread:$0]  %s679_s0, 256, %s606_s18, [#allocation3], %s574_s27, %s574_s27, %s575_s28  }
  0x23   :  { %s576_s14 = smov [#allocation7]   ;;  %s522_s19 = scalar_lea.hbm %s681_s2, 6144 }
  0x24   :  { %s41_s15 = sshll.u32 %s576_s14, 4  ;;  %p523_p2 = scmp.ne.s32.totalorder %s681_s2, %s522_s19  ;;  %s42_s15 = int_to_ptr.vmem [resolvable:$true] %s41_s15 }
  0x25   :  { %p526_p3 = scmp.lt.u32.totalorder %s522_s19, %s681_s2 }
  0x27   :  { %p528_p4 = pnand %p526_p3, %p523_p2 }
  0x29   :  { %531 = shalt.err (!%p528_p4)
}
  0x2a   :  { %s532_s24 = scalar_lea.vmem %s42_s15, 6144  ;;  %p537_p6 = scmp.lt.s32.totalorder %s42_s15, %s42_s15 }
  0x2b   :  { %p533_p5 = scmp.ne.s32.totalorder %s42_s15, %s532_s24  ;;  %p538_p7 = scmp.lt.s32.totalorder %s532_s24, %s532_s24 }
  0x2d   :  { %p539_p8 = por %p538_p7, %p537_p6 }
  0x2f   :  { %p540_p9 = pnand %p539_p8, %p533_p5 }
  0x31   :  { %543 = shalt.err (!%p540_p9)
}
  0x32   :  { %s577_s0 = smov 384   ;;  %s578_s18 = smov 24  }
  0x33   :  { %47 = dma.hbm_to_vmem [thread:$0]  %s681_s2, 6144, %s42_s15, [#allocation6], %s577_s0, %s577_s0, %s578_s18  }
  0x34   :  { %566 = dma.done.wait [#allocation3], 256  }
  0x35   :  { %567 = vsyncadd [#allocation3], 4294967040 }
  0x36   :  { %568 = dma.done.wait [#allocation6], 6400  }
  0x37   :  { %569 = vsyncadd [#allocation6], 4294960896  ;;  %v579_v0 = vmov 0.0   ;;  %v64_v1 = vld [vmem:[#allocation7 + $0x8] sm:$0xff]  ;;  %v67_v2 = vld [vmem:[#allocation7 + $0x20] sm:$0xff] }
  0x38   :  { %192 = vmatprep.mubr.f32.mxu0 %v579_v0  ;;  %v63_v3 = vld [vmem:[#allocation7] sm:$0xff]  ;;  %v393_v4 = vpack.c.bf16 %v67_v2, %v64_v1  ;;  %v66_v5 = vld [vmem:[#allocation7 + $0x18] sm:$0xff]  ;;  %v73_v7 = vld [vmem:[#allocation7 + $0x50] sm:$0xff] }
  0x39   :  { %v70_v6 = vld [vmem:[#allocation7 + $0x38] sm:$0xff]  ;;  %v395_v8 = vpack.c.bf16 %v66_v5, %v63_v3  ;;  %v69_v10 = vld [vmem:[#allocation7 + $0x30] sm:$0xff]  ;;  %v72_v11 = vld [vmem:[#allocation7 + $0x48] sm:$0xff] }
  0x3a   :  { %v397_v9 = vpack.c.bf16 %v73_v7, %v70_v6  ;;  %v76_v12 = vld [vmem:[#allocation7 + $0x68] sm:$0xff]  ;;  %394 = vmatprep.subr.bf16.mxu0 %v393_v4  ;;  %v79_v13 = vld [vmem:[#allocation7 + $0x80] sm:$0xff]  ;;  %v399_v14 = vpack.c.bf16 %v72_v11, %v69_v10  ;;  %v78_v17 = vld [vmem:[#allocation7 + $0x78] sm:$0xff] }
  0x3b   :  { %396 = vmatpush1.bf16.msra.mxu0 %v395_v8  ;;  %v401_v15 = vpack.c.bf16 %v79_v13, %v76_v12  ;;  %v75_v16 = vld [vmem:[#allocation7 + $0x60] sm:$0xff]  ;;  %v82_v18 = vld [vmem:[#allocation7 + $0x98] sm:$0xff]  ;;  %v85_v19 = vld [vmem:[#allocation7 + $0xb0] sm:$0xff]  ;;  %v113_v12 = vlaneseq }
  0x3c   :  { %398 = vmatprep.subr.bf16.mxu0 %v397_v9  ;;  %v403_v20 = vpack.c.bf16 %v78_v17, %v75_v16  ;;  %v405_v21 = vpack.c.bf16 %v85_v19, %v82_v18  ;;  %v81_v22 = vld [vmem:[#allocation7 + $0x90] sm:$0xff]  ;;  %v84_v23 = vld [vmem:[#allocation7 + $0xa8] sm:$0xff]  ;;  %v91_v25 = vld [vmem:[#allocation7 + $0xe0] sm:$0xff] }
  0x3d   :  { %v88_v24 = vld [vmem:[#allocation7 + $0xc8] sm:$0xff]  ;;  %v65_v26 = vld [vmem:[#allocation7 + $0x10] sm:$0xff]  ;;  %v71_v29 = vld [vmem:[#allocation7 + $0x40] sm:$0xff]  ;;  %v407_v30 = vpack.c.bf16 %v84_v23, %v81_v22  ;;  %v114_v13 = vshrl.u32 %v113_v12, 7 }
  0x3e   :  { %v68_v27 = vld [vmem:[#allocation7 + $0x28] sm:$0xff]  ;;  %v656_v28 = vld [vmem:[#allocation5] sm:$0xff]  ;;  %v87_v31 = vld [vmem:[#allocation7 + $0xc0] sm:$0xff]  ;;  %v409_v34 = vpack.c.bf16 %v91_v25, %v88_v24 }
  0x3f   :  { %400 = vmatpush1.bf16.msra.mxu0 %v399_v14  ;;  %v425_v32 = vpack.c.bf16 %v68_v27, %v65_v26  ;;  %v74_v33 = vld [vmem:[#allocation7 + $0x58] sm:$0xff]  ;;  %390 = vmatprep.mubr.f32.mxu1 %v656_v28  ;;  %v77_v37 = vld [vmem:[#allocation7 + $0x70] sm:$0xff]  ;;  %v80_v38 = vld [vmem:[#allocation7 + $0x88] sm:$0xff]  ;;  %v115_v14 = vsub.s32 0, %v114_v13  ;;  %v119_v16 = vsub.s32 1, %v114_v13 }
  0x40   :  { %402 = vmatprep.subr.bf16.mxu0 %v401_v15  ;;  %v90_v35 = vld [vmem:[#allocation7 + $0xd8] sm:$0xff]  ;;  %v429_v36 = vpack.c.bf16 %v74_v33, %v71_v29  ;;  %v97_v40 = vld [vmem:[#allocation7 + $0x110] sm:$0xff]  ;;  %v433_v43 = vpack.c.bf16 %v80_v38, %v77_v37  ;;  %v96_v45 = vld [vmem:[#allocation7 + $0x108] sm:$0xff] }
  0x41   :  { %v94_v39 = vld [vmem:[#allocation7 + $0xf8] sm:$0xff]  ;;  %426 = vmatprep.subr.bf16.mxu1 %v425_v32  ;;  %v411_v41 = vpack.c.bf16 %v90_v35, %v87_v31  ;;  %v93_v42 = vld [vmem:[#allocation7 + $0xf0] sm:$0xff]  ;;  %v83_v46 = vld [vmem:[#allocation7 + $0xa0] sm:$0xff] }
  0x42   :  { %428 = vmatpush3.bf16.msra.mxu1 %v425_v32  ;;  %v413_v44 = vpack.c.bf16 %v97_v40, %v94_v39  ;;  %v86_v47 = vld [vmem:[#allocation7 + $0xb8] sm:$0xff]  ;;  %v100_v48 = vld [vmem:[#allocation7 + $0x128] sm:$0xff]  ;;  %v103_v49 = vld [vmem:[#allocation7 + $0x140] sm:$0xff]  ;;  %v415_v50 = vpack.c.bf16 %v96_v45, %v93_v42 }
  0x43   :  { %404 = vmatpush1.bf16.msra.mxu0 %v403_v20  ;;  %430 = vmatprep.subr.bf16.mxu1 %v429_v36  ;;  %v99_v51 = vld [vmem:[#allocation7 + $0x120] sm:$0xff]  ;;  %v437_v52 = vpack.c.bf16 %v86_v47, %v83_v46  ;;  %v417_v53 = vpack.c.bf16 %v103_v49, %v100_v48  ;;  %v102_v54 = vld [vmem:[#allocation7 + $0x138] sm:$0xff]  ;;  %v89_v55 = vld [vmem:[#allocation7 + $0xd0] sm:$0xff] }
  0x44   :  { %406 = vmatprep.subr.bf16.mxu0 %v405_v21  ;;  %v92_v56 = vld [vmem:[#allocation7 + $0xe8] sm:$0xff]  ;;  %v106_v57 = vld [vmem:[#allocation7 + $0x158] sm:$0xff]  ;;  %v109_v58 = vld [vmem:[#allocation7 + $0x170] sm:$0xff]  ;;  %v419_v59 = vpack.c.bf16 %v102_v54, %v99_v51 }
  0x45   :  { %v105_v60 = vld [vmem:[#allocation7 + $0x150] sm:$0xff]  ;;  %v441_v61 = vpack.c.bf16 %v92_v56, %v89_v55  ;;  %v421_v62 = vpack.c.bf16 %v109_v58, %v106_v57  ;;  %v108_v63 = vld [vmem:[#allocation7 + $0x168] sm:$0xff]  ;;  %v95_v1 = vld [vmem:[#allocation7 + $0x100] sm:$0xff] }
  0x46   :  { %432 = vmatpush3.bf16.msra.mxu1 %v429_v36  ;;  %v98_v2 = vld [vmem:[#allocation7 + $0x118] sm:$0xff]  ;;  %v423_v3 = vpack.c.bf16 %v108_v63, %v105_v60  ;;  %v101_v5 = vld [vmem:[#allocation7 + $0x130] sm:$0xff]  ;;  %v104_v6 = vld [vmem:[#allocation7 + $0x148] sm:$0xff] }
  0x47   :  { %408 = vmatpush1.bf16.msra.mxu0 %v407_v30  ;;  %434 = vmatprep.subr.bf16.mxu1 %v433_v43  ;;  %v445_v4 = vpack.c.bf16 %v98_v2, %v95_v1  ;;  %v449_v7 = vpack.c.bf16 %v104_v6, %v101_v5  ;;  %v107_v8 = vld [vmem:[#allocation7 + $0x160] sm:$0xff]  ;;  %v110_v9 = vld [vmem:[#allocation7 + $0x178] sm:$0xff]  ;;  %v60_v56 = vld [vmem:[#allocation2 + $0x8] sm:$0xff] }
  0x48   :  { %410 = vmatprep.subr.bf16.mxu0 %v409_v34  ;;  %v62_v10 = vld [vmem:[#allocation5 + $0x8] sm:$0xff]  ;;  %v453_v11 = vpack.c.bf16 %v110_v9, %v107_v8  ;;  %v111_v15 = vld [vmem:[%s682_s3] sm:$0x7]  ;;  %s580_s3 = smov [#allocation8]  }
  0x49   :  { %v116_v17 = vrot.slane %v111_v15, %v115_v14  ;;  %v120_v18 = vrot.slane %v111_v15, %v119_v16  ;;  %v59_v51 = vld [vmem:[#allocation2] sm:$0xff]  ;;  %s323_s30 = sshll.u32 %s580_s3, 4  ;;  %s324_s30 = int_to_ptr.vmem [resolvable:$true] %s323_s30 }
  0x4a   :  { %436 = vmatpush3.bf16.msra.mxu1 %v433_v43  ;;  %v123_v43 = vsub.s32 2, %v114_v13  ;;  %s544_s5 = scalar_lea.vmem %s324_s30, 256  ;;  %p549_p11 = scmp.lt.s32.totalorder %s324_s30, %s324_s30 }
  0x4b   :  { %412 = vmatpush1.bf16.msra.mxu0 %v411_v41  ;;  %438 = vmatprep.subr.bf16.mxu1 %v437_v52  ;;  %p545_p10 = scmp.ne.s32.totalorder %s324_s30, %s544_s5  ;;  %p550_p12 = scmp.lt.s32.totalorder %s544_s5, %s544_s5 }
  0x4c   :  { %414 = vmatprep.subr.bf16.mxu0 %v413_v44  ;;  %v124_v48 = vrot.slane %v111_v15, %v123_v43 }
  0x4d   :  { %p551_p13 = por %p550_p12, %p549_p11 }
  0x4e   :  { %440 = vmatpush3.bf16.msra.mxu1 %v437_v52 }
  0x4f   :  { %416 = vmatpush1.bf16.msra.mxu0 %v415_v50  ;;  %442 = vmatprep.subr.bf16.mxu1 %v441_v61  ;;  %p552_p0 = pnand %p551_p13, %p545_p10 }
  0x50   :  { %418 = vmatprep.subr.bf16.mxu0 %v417_v53 }
  0x52   :  { %444 = vmatpush3.bf16.msra.mxu1 %v441_v61 }
  0x53   :  { %420 = vmatpush1.bf16.msra.mxu0 %v419_v59  ;;  %446 = vmatprep.subr.bf16.mxu1 %v445_v4 }
  0x54   :  { %422 = vmatprep.subr.bf16.mxu0 %v421_v62 }
  0x56   :  { %448 = vmatpush3.bf16.msra.mxu1 %v445_v4 }
  0x57   :  { %424 = vmatpush1.bf16.msra.mxu0 %v423_v3  ;;  %450 = vmatprep.subr.bf16.mxu1 %v449_v7 }
  0x5a   :  { %193 = vmatmul.mubr.f32.vlgmr.msra.gmra.mrb[0].mxu0 %v656_v28  ;;  %452 = vmatpush3.bf16.msra.mxu1 %v449_v7 }
  0x5b   :  { %198 = vmatprep.mubr.f32.mxu0 %v579_v0  ;;  %454 = vmatprep.subr.bf16.mxu1 %v453_v11 }
  0x5e   :  { %199 = vmatmul.mubr.f32.gmra.mrb[2].mxu0 %v62_v10  ;;  %456 = vmatpush3.bf16.msra.mxu1 %v453_v11 }
  0x61   :  { %391 = vmatmul.mubr.f32.vlgmr.msra.gmra.mrb[0].mxu1 %v62_v10 }
 0x12d   :  { %v194_v19 = vpop.f32.mrb[0].mxu0 }
 0x12e   :  { %v195_v0 = vadd.f32 %v194_v19, %v116_v17  ;;  %v196_v20 = vpop.f32.mrb[1].mxu0 }
 0x12f   :  { %v197_v21 = vadd.f32 %v196_v20, %v120_v18 }
 0x130   :  { %v336_v22 = vclamps-f32 %v195_v0, 30.0 }
 0x131   :  { %v338_v23 = vclamps-f32 %v197_v21, 30.0  ;;  %v200_v24 = vpop.f32.mrb[2].mxu0 }
 0x132   :  { %v284_v25 = vsub.f32 0.0, %v336_v22  ;;  %v201_v26 = vadd.f32 %v200_v24, %v116_v17  ;;  %v202_v27 = vpop.f32.mrb[3].mxu0 }
 0x133   :  { %v294_v28 = vsub.f32 0.0, %v338_v23  ;;  %v203_v29 = vadd.f32 %v202_v27, %v120_v18 }
 0x134   :  { %v286_v30 = vmul.f32 1.442695, %v284_v25  ;;  %v337_v31 = vclamps-f32 %v201_v26, 30.0  ;;  %v392_v37 = vpop.f32.mrb[0].mxu1 }
 0x135   :  { %v296_v32 = vmul.f32 1.442695, %v294_v28  ;;  %v339_v33 = vclamps-f32 %v203_v29, 30.0  ;;  %v271_v39 = vpop.f32.mrb[1].mxu1  ;;  %v277_v52 = vadd.f32 %v392_v37, %v124_v48 }
 0x136   :  { %466 = vpow2.f32 %v286_v30  ;;  %v285_v34 = vsub.f32 0.0, %v337_v31  ;;  %v272_v50 = vadd.f32 %v271_v39, %v124_v48 }
 0x137   :  { %468 = vpow2.f32 %v296_v32  ;;  %v295_v35 = vsub.f32 0.0, %v339_v33  ;;  %v311_v59 = vsub.f32 %v60_v56, %v277_v52 }
 0x138   :  { %v288_v36 = vmul.f32 1.442695, %v285_v34  ;;  %v310_v54 = vsub.f32 %v59_v51, %v272_v50 }
 0x139   :  { %v298_v38 = vmul.f32 1.442695, %v295_v35 }
 0x13a   :  { %470 = vpow2.f32 %v288_v36 }
 0x13b   :  { %472 = vpow2.f32 %v298_v38 }
 0x140   :  { %v467_v40 = vpop.eup %466 }
 0x141   :  { %v469_v41 = vpop.eup %468  ;;  %v302_v42 = vadd.f32 2.0, %v467_v40 }
 0x142   :  { %v300_v53 = vadd.f32 1.0, %v469_v41 }
 0x143   :  { %v304_v44 = vadd.f32 %v469_v41, %v302_v42 }
 0x144   :  { %v471_v45 = vpop.eup %470 }
 0x145   :  { %v473_v46 = vpop.eup %472  ;;  %474 = vrcp.f32 %v304_v44  ;;  %v303_v47 = vadd.f32 2.0, %v471_v45 }
 0x146   :  { %v301_v58 = vadd.f32 1.0, %v473_v46 }
 0x147   :  { %v305_v49 = vadd.f32 %v473_v46, %v303_v47 }
 0x149   :  { %476 = vrcp.f32 %v305_v49 }
 0x14f   :  { %v475_v55 = vpop.eup %474 }
 0x150   :  { %v307_v57 = vmul.f32 %v475_v55, %v300_v53 }
 0x152   :  { %v312_v60 = vmul.f32 %v310_v54, %v307_v57 }
 0x153   :  { %v477_v61 = vpop.eup %476 }
 0x154   :  { %v309_v62 = vmul.f32 %v477_v61, %v301_v58  ;;  %v314_v63 = vadd.f32 %v312_v60, %v272_v50 }
 0x156   :  { %v313_v1 = vmul.f32 %v311_v59, %v309_v62  ;;  %316 = vst [vmem:[#allocation8] sm:$0xff] %v314_v63 }
 0x158   :  { %v315_v2 = vadd.f32 %v313_v1, %v277_v52 }
 0x15a   :  { %317 = vst [vmem:[#allocation8 + $0x8] sm:$0xff] %v315_v2 }
 0x15b   :  { %555 = shalt.err (!%p552_p0)
}
 0x15c   :  { %s556_s8 = scalar_lea.hbm %s683_s4, 256 }
 0x15d   :  { %p557_p1 = scmp.ne.s32.totalorder %s683_s4, %s556_s8  ;;  %p560_p2 = scmp.lt.u32.totalorder %s556_s8, %s683_s4 }
 0x15f   :  { %p562_p3 = pnand %p560_p2, %p557_p1 }
 0x161   :  { %565 = shalt.err (!%p562_p3)
}
 0x162   :  { %329 = dma.vmem_to_hbm [thread:$0]  %s324_s30, 256, %s683_s4, [#allocation4], %s574_s27, %s574_s27, %s575_s28  }
 0x163   :  { %570 = dma.done.wait [#allocation4], 256  }
 0x164   :  { %571 = vsyncadd [#allocation4], 4294967040 }
 0x165   :  { %333 = vsyncpa [#allocation3], 1 }
 0x166   :  { %334 = vsyncpa [#allocation6], 1 }
 0x167   :  { %335 = vsyncpa [#allocation4], 1 }

</bundles_post_ra>
